<compile_context>
chip_gen: v7x
topology: tpu7x:2x2x1
jax: 0.10.0
libtpu: 0.0.40
codegen_flags: <defaults>
</compile_context>

<pallas_src>
import functools

import jax
import jax.numpy as jnp
from jax.experimental import pallas as pl
from jax.experimental.pallas import tpu as pltpu


def _round_up(x, m):
    return ((x + m - 1) // m) * m


def _pad_to(a, shape):
    pads = [(0, s - d) for d, s in zip(a.shape, shape)]
    if any(p[1] for p in pads):
        a = jnp.pad(a, pads)
    return a


def _pick_block(dim_p, unit, target):
    """Largest multiple of `unit` that divides dim_p and is <= target.

    dim_p is already a multiple of `unit`, so `unit` itself always divides it;
    divisor-based tiles avoid inflating the padded dims to whole-tile multiples.
    """
    target = max(unit, min(target, dim_p))
    best = unit
    cand = unit
    while cand <= target:
        if dim_p % cand == 0:
            best = cand
        cand += unit
    return best


def _tracked_mlp_kernel(*refs, positive_inputs, norm_inputs, add_bias):
    # refs = (x, w[, bias], out, acc[, sumsq])
    x_ref, w_ref = refs[0], refs[1]
    idx = 2
    b_ref = None
    if add_bias:
        b_ref = refs[idx]
        idx += 1
    o_ref = refs[idx]
    idx += 1
    acc_ref = refs[idx]
    idx += 1
    ss_ref = refs[idx] if norm_inputs else None

    k = pl.program_id(2)

    @pl.when(k == 0)
    def _init():
        acc_ref[...] = jnp.zeros_like(acc_ref)
        if norm_inputs:
            ss_ref[...] = jnp.zeros_like(ss_ref)

    x = x_ref[...]                       # [block_b, block_k], native dtype
    if positive_inputs:
        x = jnp.maximum(x, 0)

    if norm_inputs:
        # Accumulate per-row sum of squares of (relu'd) x across k tiles; the
        # rsqrt scale is applied once to the f32 accumulator in the epilogue.
        xf = x.astype(jnp.float32)
        ss_ref[...] += jnp.sum(xf * xf, axis=-1, keepdims=True)

    # MXU matmul, f32 accumulation; weight is pre-transposed to [D_in, D_out].
    acc_ref[...] += jnp.dot(x, w_ref[...], preferred_element_type=jnp.float32)

    @pl.when(k == pl.num_programs(2) - 1)
    def _finalize():
        out = acc_ref[...]
        if norm_inputs:
            out = out * jax.lax.rsqrt(ss_ref[...])   # EUP rsqrt, per-row scale
        if add_bias:
            out = out + b_ref[...]                   # [1, block_n] broadcast
        o_ref[...] = out.astype(o_ref.dtype)


def prepare_tracked_mlp_params(weight, bias=None, shared_bias=None, *,
                               use_bias=True, use_shared_bias=False,
                               mxu_dtype=None):
    """One-time host-side prep (hoist out of the per-call hot path / cache it).

    weight:      [D_out, D_in]   (PyTorch nn.Linear convention)
    bias:        [D_out]         (ignored if use_bias=False)
    shared_bias: scalar          (ignored if use_shared_bias=False)
    Returns a dict consumed by tracked_mlp_layer(prepared=...).
    """
    D_out, D_in = weight.shape
    D_in_p = _round_up(D_in, 128)
    D_out_p = _round_up(D_out, 128)

    w_dtype = mxu_dtype if mxu_dtype is not None else weight.dtype
    w_t = _pad_to(jnp.transpose(weight).astype(w_dtype), (D_in_p, D_out_p))

    add_bias = bool(use_bias or use_shared_bias)
    b2d = None
    if add_bias:
        b = jnp.zeros((D_out,), jnp.float32)
        if use_bias:
            b = b + bias.astype(jnp.float32)
        if use_shared_bias:
            b = b + jnp.reshape(shared_bias, ()).astype(jnp.float32)
        b2d = _pad_to(jnp.reshape(b, (1, D_out)), (1, D_out_p))

    return dict(w_t=w_t, b2d=b2d, D_in=D_in, D_out=D_out,
                D_in_p=D_in_p, D_out_p=D_out_p, add_bias=add_bias)


def tracked_mlp_layer(x, weight=None, bias=None, shared_bias=None, *,
                      positive_inputs=False, norm_inputs=False,
                      use_bias=True, use_shared_bias=False,
                      prepared=None, mxu_dtype=None,
                      block_b=None, block_n=None, block_k=None):
    """Pallas implementation of TrackedMLPLayer.forward.

    x: [B, D_in]. Either pass `weight` (+bias/shared_bias) or a cached
    `prepared=prepare_tracked_mlp_params(...)`.
    `mxu_dtype=jnp.bfloat16` optionally feeds bf16 operands to the MXU
    (f32 accumulation and bias/epilogue are kept in f32).
    """
    if prepared is None:
        prepared = prepare_tracked_mlp_params(
            weight, bias, shared_bias,
            use_bias=use_bias, use_shared_bias=use_shared_bias,
            mxu_dtype=mxu_dtype)

    w_t = prepared["w_t"]
    b2d = prepared["b2d"]
    D_in, D_out = prepared["D_in"], prepared["D_out"]
    D_in_p, D_out_p = prepared["D_in_p"], prepared["D_out_p"]
    add_bias = prepared["add_bias"]

    B, xD = x.shape
    assert xD == D_in, f"x last dim {xD} != weight inp_dim {D_in}"
    out_dtype = x.dtype

    B_p = _round_up(B, 8)
    x_dtype = mxu_dtype if mxu_dtype is not None else x.dtype
    x_p = _pad_to(x.astype(x_dtype), (B_p, D_in_p))

    # ---- tile selection: divisors of the padded dims (no work inflation) ----
    tb = 512 if block_b is None else block_b
    tk = 2048 if block_k is None else block_k
    if block_n is None:
        # Tiny-batch regime is weight-bandwidth bound: widen the output tile.
        tn = 1024 if B_p <= 64 else 512
    else:
        tn = block_n

    block_b = _pick_block(B_p, 8, tb)        # sublane multiple
    block_n = _pick_block(D_out_p, 128, tn)  # lane multiple
    block_k = _pick_block(D_in_p, 128, tk)   # lane (x) / sublane (w) multiple

    n_i = B_p // block_b
    n_j = D_out_p // block_n
    n_k = D_in_p // block_k
    # j (D_out) outermost: a v7x megacore split along j gives each core half of
    # W instead of streaming the full weight per core; k innermost (reduction).
    grid = (n_j, n_i, n_k)
    if n_j > 1:
        dims = ("parallel", "arbitrary", "arbitrary")
    else:
        dims = ("arbitrary", "parallel", "arbitrary")

    in_specs = [
        pl.BlockSpec((block_b, block_k), lambda j, i, k: (i, k)),   # x tile
        pl.BlockSpec((block_k, block_n), lambda j, i, k: (k, j)),   # W.T tile
    ]
    operands = [x_p, w_t]
    if add_bias:
        in_specs.append(pl.BlockSpec((1, block_n), lambda j, i, k: (0, j)))
        operands.append(b2d)

    scratch_shapes = [pltpu.VMEM((block_b, block_n), jnp.float32)]   # acc
    if norm_inputs:
        scratch_shapes.append(pltpu.VMEM((block_b, 1), jnp.float32))  # sumsq

    # ---- VMEM budget: double-buffered inputs/outputs + scratch, with headroom.
    in_is = jnp.dtype(x_p.dtype).itemsize
    w_is = jnp.dtype(w_t.dtype).itemsize
    out_is = jnp.dtype(out_dtype).itemsize
    working = (2 * block_b * block_k * in_is
               + 2 * block_k * block_n * w_is
               + 2 * block_b * block_n * out_is
               + block_b * block_n * 4)
    if add_bias:
        working += 2 * block_n * 4
    if norm_inputs:
        working += block_b * 128 * 4
    vmem_limit = int(min(64 * 1024 * 1024,
                         max(16 * 1024 * 1024, working * 3 // 2 + (2 << 20))))

    cost = pl.CostEstimate(
        flops=2 * B * D_in * D_out,
        transcendentals=B if norm_inputs else 0,
        bytes_accessed=int(n_j * x_p.size * in_is        # x re-streamed per j
                           + n_i * w_t.size * w_is       # W re-streamed per i
                           + B_p * D_out_p * out_is
                           + (n_i * D_out_p * 4 if add_bias else 0)),
    )

    kernel = functools.partial(
        _tracked_mlp_kernel,
        positive_inputs=positive_inputs,
        norm_inputs=norm_inputs,
        add_bias=add_bias,
    )

    out_p = pl.pallas_call(
        kernel,
        out_shape=jax.ShapeDtypeStruct((B_p, D_out_p), out_dtype),
        grid_spec=pltpu.PrefetchScalarGridSpec(
            num_scalar_prefetch=0,
            grid=grid,
            in_specs=in_specs,
            out_specs=pl.BlockSpec((block_b, block_n), lambda j, i, k: (i, j)),
            scratch_shapes=scratch_shapes,
        ),
        compiler_params=pltpu.CompilerParams(
            dimension_semantics=dims,
            vmem_limit_bytes=vmem_limit),
        cost_estimate=cost,
    )(*operands)

    return out_p[:B, :D_out]


def _reference(x, weight, bias, shared_bias, *, positive_inputs, norm_inputs,
               use_bias, use_shared_bias):
    x = x.astype(jnp.float32)
    if positive_inputs:
        x = jnp.maximum(x, 0.0)
    if norm_inputs:
        x = x / jnp.linalg.norm(x, axis=1, keepdims=True)
    out = x @ weight.astype(jnp.float32).T
    if use_bias:
        out = out + bias
    if use_shared_bias:
        out = out + shared_bias
    return out


if __name__ == "__main__":
    key = jax.random.PRNGKey(0)

    configs = [
        # (positive_inputs, norm_inputs, use_bias, use_shared_bias)
        dict(positive_inputs=False, norm_inputs=False,
             use_bias=True, use_shared_bias=False),
        dict(positive_inputs=True, norm_inputs=True,
             use_bias=False, use_shared_bias=True),
        dict(positive_inputs=False, norm_inputs=False,
             use_bias=False, use_shared_bias=False),   # bias operand dropped
    ]

    # (B, D_in, D_out, block_b, block_n, block_k)
    # Second case forces a multi-point grid with K-tiling (2 x 3 x 3) and
    # exercises padding of all three dims.
    cases = [
        (8, 32, 16, None, None, None),
        (16, 300, 260, 8, 128, 128),
    ]

    for case_idx, (B, D_in, D_out, bb, bn, bk) in enumerate(cases):
        kx, kw, kb = jax.random.split(jax.random.fold_in(key, case_idx), 3)
        x = jax.random.normal(kx, (B, D_in), dtype=jnp.float32)
        bound = 1.0 / (D_in ** 0.5)
        weight = jax.random.uniform(kw, (D_out, D_in), jnp.float32,
                                    -bound, bound)
        bias = jax.random.uniform(kb, (D_out,), jnp.float32, -bound, bound)
        shared_bias = jnp.float32(0.123)

        for cfg in configs:
            # One-time host prep (cacheable across calls); also exercises the
            # `prepared=` fast path.
            prepared = prepare_tracked_mlp_params(
                weight, bias, shared_bias,
                use_bias=cfg["use_bias"], use_shared_bias=cfg["use_shared_bias"])
            out = tracked_mlp_layer(
                x, prepared=prepared,
                positive_inputs=cfg["positive_inputs"],
                norm_inputs=cfg["norm_inputs"],
                use_bias=cfg["use_bias"],
                use_shared_bias=cfg["use_shared_bias"],
                block_b=bb, block_n=bn, block_k=bk)
            out = jax.block_until_ready(out)
            ref = _reference(x, weight, bias, shared_bias, **cfg)
            assert out.shape == (B, D_out)
            err = jnp.max(jnp.abs(out - ref))
            assert jnp.allclose(out, ref, atol=1e-4, rtol=1e-4), (
                f"mismatch for case {case_idx} cfg {cfg}: max err {err}")

    print("KERNEL_OK")
</pallas_src>

<mosaic_0001>
module attributes {stable_mosaic.version = 11 : i64} {
  func.func @_tracked_mlp_kernel(%arg0: i32, %arg1: i32, %arg2: i32, %arg3: memref<8x128xf32, #tpu.memory_space<vmem>>, %arg4: memref<128x128xf32, #tpu.memory_space<vmem>>, %arg5: memref<1x128xf32, #tpu.memory_space<vmem>>, %arg6: memref<8x128xf32, #tpu.memory_space<vmem>>, %arg7: memref<8x128xf32, #tpu.memory_space<vmem>>) attributes {dimension_semantics = [#tpu.dimension_semantics<arbitrary>, #tpu.dimension_semantics<parallel>, #tpu.dimension_semantics<arbitrary>], iteration_bounds = array<i64: 1, 1, 1>, scalar_prefetch = 0 : i64, scratch_operands = 1 : i64, tpu.core_type = #tpu.core_type<tc>, window_params = [{transform_indices = @transform_0, window_bounds = array<i64: 8, 128>}, {transform_indices = @transform_1, window_bounds = array<i64: 128, 128>}, {transform_indices = @transform_2, window_bounds = array<i64: 1, 128>}, {transform_indices = @transform_3, window_bounds = array<i64: 8, 128>}]} {
    %c0_i32 = arith.constant 0 : i32
    %0 = arith.cmpi eq, %arg2, %c0_i32 : i32
    %1 = arith.extui %0 : i1 to i32
    %c0_i32_0 = arith.constant 0 : i32
    %2 = arith.cmpi ne, %1, %c0_i32_0 : i32
    scf.if %2 {
      %cst_10 = arith.constant 0.000000e+00 : f32
      %12 = vector.broadcast %cst_10 : f32 to vector<8x128xf32>
      %c0_11 = arith.constant 0 : index
      %c0_12 = arith.constant 0 : index
      %13 = vector.load %arg7[%c0_11, %c0_12] : memref<8x128xf32, #tpu.memory_space<vmem>>, vector<8x128xf32>
      tpu.vector_store %arg7[%c0_11, %c0_12], %12 {strides = array<i32>} : memref<8x128xf32, #tpu.memory_space<vmem>>, vector<8x128xf32>,
    } else {
    }
    %c0 = arith.constant 0 : index
    %c0_1 = arith.constant 0 : index
    %3 = vector.load %arg3[%c0, %c0_1] : memref<8x128xf32, #tpu.memory_space<vmem>>, vector<8x128xf32>
    %c0_2 = arith.constant 0 : index
    %c0_3 = arith.constant 0 : index
    %4 = vector.load %arg7[%c0_2, %c0_3] : memref<8x128xf32, #tpu.memory_space<vmem>>, vector<8x128xf32>
    %c0_4 = arith.constant 0 : index
    %c0_5 = arith.constant 0 : index
    %5 = vector.load %arg4[%c0_4, %c0_5] : memref<128x128xf32, #tpu.memory_space<vmem>>, vector<128x128xf32>
    %cst = arith.constant dense<0.000000e+00> : vector<8x128xf32>
    %6 = tpu.matmul %3, %5, %cst {dimension_numbers = #tpu.dot_dimension_numbers<[1], [0], [0], [1], [0, 0, 1, 1], [], []>} : vector<8x128xf32>, vector<128x128xf32>, vector<8x128xf32> -> vector<8x128xf32>
    %7 = arith.addf %4, %6 : vector<8x128xf32>
    %c0_6 = arith.constant 0 : index
    %c0_7 = arith.constant 0 : index
    %8 = vector.load %arg7[%c0_6, %c0_7] : memref<8x128xf32, #tpu.memory_space<vmem>>, vector<8x128xf32>
    tpu.vector_store %arg7[%c0_6, %c0_7], %7 {strides = array<i32>} : memref<8x128xf32, #tpu.memory_space<vmem>>, vector<8x128xf32>,
    %c0_i32_8 = arith.constant 0 : i32
    %9 = arith.cmpi eq, %arg2, %c0_i32_8 : i32
    %10 = arith.extui %9 : i1 to i32
    %c0_i32_9 = arith.constant 0 : i32
    %11 = arith.cmpi ne, %10, %c0_i32_9 : i32
    scf.if %11 {
      %c0_10 = arith.constant 0 : index
      %c0_11 = arith.constant 0 : index
      %12 = vector.load %arg7[%c0_10, %c0_11] : memref<8x128xf32, #tpu.memory_space<vmem>>, vector<8x128xf32>
      %c0_12 = arith.constant 0 : index
      %c0_13 = arith.constant 0 : index
      %13 = vector.load %arg5[%c0_12, %c0_13] : memref<1x128xf32, #tpu.memory_space<vmem>>, vector<1x128xf32>
      %14 = vector.broadcast %13 : vector<1x128xf32> to vector<8x128xf32>
      %15 = arith.addf %12, %14 : vector<8x128xf32>
      %c0_14 = arith.constant 0 : index
      %c0_15 = arith.constant 0 : index
      %16 = vector.load %arg6[%c0_14, %c0_15] : memref<8x128xf32, #tpu.memory_space<vmem>>, vector<8x128xf32>
      tpu.vector_store %arg6[%c0_14, %c0_15], %15 {strides = array<i32>} : memref<8x128xf32, #tpu.memory_space<vmem>>, vector<8x128xf32>,
    } else {
    }
    return
  }
  func.func @transform_0(%arg0: i32, %arg1: i32, %arg2: i32) -> (i32, i32) {
    %c0_i32 = arith.constant 0 : i32
    return %arg1, %arg2 : i32, i32
  }
  func.func @transform_1(%arg0: i32, %arg1: i32, %arg2: i32) -> (i32, i32) {
    %c0_i32 = arith.constant 0 : i32
    return %arg2, %arg0 : i32, i32
  }
  func.func @transform_2(%arg0: i32, %arg1: i32, %arg2: i32) -> (i32, i32) {
    %c0_i32 = arith.constant 0 : i32
    %c0_i32_0 = arith.constant 0 : i32
    return %c0_i32, %arg0 : i32, i32
  }
  func.func @transform_3(%arg0: i32, %arg1: i32, %arg2: i32) -> (i32, i32) {
    %c0_i32 = arith.constant 0 : i32
    return %arg1, %arg0 : i32, i32
  }
}

</mosaic_0001>

<bundles_post_ra>
// kernel: tpu_custom_call.1
= control target key start
LH: loop header
LB: loop body
LE: loop exit
PB: predicated region body
PF: predicated region fallthrough
CT: control target
= control target key end

     0   :  { %8 = vsyncpa [#allocation4], 0  ;;  %s396_s0 = inlined_call_operand.hbm [shape: f32[8,128], index: 0, kind: input, shape index: {}]   ;;  %s397_s1 = inlined_call_operand.hbm [shape: f32[128,128], index: 1, kind: input, shape index: {}]   ;;  %s398_s2 = inlined_call_operand.vmem [shape: f32[1,128], index: 2, kind: input, shape index: {}]   ;;  %s399_s3 = inlined_call_operand.hbm [shape: f32[8,128], index: 3, kind: output, shape index: {}]  }
   0x1   :  { %9 = vsyncpa [#allocation7], 0 }
   0x2   :  { %10 = vsyncpa [#allocation5], 0  ;;  %s322_s12 = smov [#allocation3]   ;;  %s323_s14 = smov [#allocation6]  }
   0x3   :  { %s17_s13 = sshll.u32 %s322_s12, 4  ;;  %s26_s15 = sshll.u32 %s323_s14, 4  ;;  %s18_s13 = int_to_ptr.vmem [resolvable:$true] %s17_s13  ;;  %s350_s15 = int_to_ptr.vmem [resolvable:$true] %s26_s15 }
   0x4   :  { %s250_s18 = scalar_lea.hbm %s396_s0, 128 }
   0x5   :  { %p251_p0 = scmp.ne.s32.totalorder %s396_s0, %s250_s18  ;;  %p254_p1 = scmp.lt.u32.totalorder %s250_s18, %s396_s0 }
   0x7   :  { %p256_p2 = pnand %p254_p1, %p251_p0 }
   0x9   :  { %259 = shalt.err (!%p256_p2)
}
   0xa   :  { %s260_s23 = scalar_lea.vmem %s18_s13, 128  ;;  %p265_p4 = scmp.lt.s32.totalorder %s18_s13, %s18_s13 }
   0xb   :  { %p261_p3 = scmp.ne.s32.totalorder %s18_s13, %s260_s23  ;;  %p266_p5 = scmp.lt.s32.totalorder %s260_s23, %s260_s23 }
   0xd   :  { %p267_p6 = por %p266_p5, %p265_p4 }
   0xf   :  { %p268_p7 = pnand %p267_p6, %p261_p3 }
  0x11   :  { %271 = shalt.err (!%p268_p7)
}
  0x12   :  { %20 = dma.hbm_to_vmem [thread:$0]  %s396_s0, 128, %s18_s13, [#allocation4]  }
  0x13   :  { %s272_s28 = scalar_lea.hbm %s397_s1, 2048 }
  0x14   :  { %p273_p8 = scmp.ne.s32.totalorder %s397_s1, %s272_s28  ;;  %p276_p9 = scmp.lt.u32.totalorder %s272_s28, %s397_s1 }
  0x16   :  { %p278_p10 = pnand %p276_p9, %p273_p8 }
  0x18   :  { %281 = shalt.err (!%p278_p10)
}
  0x19   :  { %s282_s6 = scalar_lea.vmem %s350_s15, 2048  ;;  %p287_p12 = scmp.lt.s32.totalorder %s350_s15, %s350_s15 }
  0x1a   :  { %p283_p11 = scmp.ne.s32.totalorder %s350_s15, %s282_s6  ;;  %p288_p13 = scmp.lt.s32.totalorder %s282_s6, %s282_s6 }
  0x1c   :  { %p289_p0 = por %p288_p13, %p287_p12 }
  0x1e   :  { %p290_p1 = pnand %p289_p0, %p283_p11 }
  0x20   :  { %293 = shalt.err (!%p290_p1)
}
  0x21   :  { %s324_s0 = smov 128   ;;  %s325_s7 = smov 8  }
  0x22   :  { %32 = dma.hbm_to_vmem [thread:$0]  %s397_s1, 2048, %s350_s15, [#allocation7], %s324_s0, %s324_s0, %s325_s7  }
  0x23   :  { %316 = dma.done.wait [#allocation4], 128  }
  0x24   :  { %317 = vsyncadd [#allocation4], 4294967168 }
  0x25   :  { %318 = dma.done.wait [#allocation7], 2048  }
  0x26   :  { %319 = vsyncadd [#allocation7], 4294965248  ;;  %v326_v0 = vmov 0.0|0.0   ;;  %vm327_vm0 = vmmov 0   ;;  %v328_v1 = vmov 0.0   ;;  %v48_v2 = vld [vmem:[#allocation6] sm:$0xff] }
  0x27   :  { %218 = vmatprep.subr.bf16.mxu0 %v326_v0  ;;  %215 = vmatprep.mubr.msk.f32.mxu0 %vm327_vm0, %v328_v1  ;;  %v49_v3 = vld [vmem:[#allocation6 + $0x8] sm:$0xff]  ;;  %v50_v4 = vld [vmem:[#allocation6 + $0x10] sm:$0xff]  ;;  %v51_v6 = vld [vmem:[#allocation6 + $0x18] sm:$0xff]  ;;  %s329_s11 = smov [#allocation8]  }
  0x28   :  { %v219_v5 = vpack.c.bf16 %v49_v3, %v48_v2  ;;  %v222_v7 = vpack.c.bf16 %v51_v6, %v50_v4  ;;  %v52_v8 = vld [vmem:[#allocation6 + $0x20] sm:$0xff]  ;;  %v53_v9 = vld [vmem:[#allocation6 + $0x28] sm:$0xff]  ;;  %v54_v11 = vld [vmem:[#allocation6 + $0x30] sm:$0xff]  ;;  %s155_s12 = sshll.u32 %s329_s11, 4  ;;  %s156_s12 = int_to_ptr.vmem [resolvable:$true] %s155_s12 }
  0x29   :  { %v225_v10 = vpack.c.bf16 %v53_v9, %v52_v8  ;;  %v55_v12 = vld [vmem:[#allocation6 + $0x38] sm:$0xff]  ;;  %v56_v14 = vld [vmem:[#allocation6 + $0x40] sm:$0xff]  ;;  %v57_v15 = vld [vmem:[#allocation6 + $0x48] sm:$0xff]  ;;  %s294_s13 = scalar_lea.vmem %s156_s12, 128  ;;  %p299_p3 = scmp.lt.s32.totalorder %s156_s12, %s156_s12 }
  0x2a   :  { %220 = vmatpush3.bf16.msra.mxu0 %v219_v5  ;;  %v228_v13 = vpack.c.bf16 %v55_v12, %v54_v11  ;;  %v231_v16 = vpack.c.bf16 %v57_v15, %v56_v14  ;;  %v58_v17 = vld [vmem:[#allocation6 + $0x50] sm:$0xff]  ;;  %v59_v18 = vld [vmem:[#allocation6 + $0x58] sm:$0xff]  ;;  %v60_v20 = vld [vmem:[#allocation6 + $0x60] sm:$0xff]  ;;  %p295_p2 = scmp.ne.s32.totalorder %s156_s12, %s294_s13  ;;  %p300_p4 = scmp.lt.s32.totalorder %s294_s13, %s294_s13 }
  0x2b   :  { %221 = vmatprep.subr.bf16.mxu0 %v326_v0  ;;  %v234_v19 = vpack.c.bf16 %v59_v18, %v58_v17  ;;  %v61_v21 = vld [vmem:[#allocation6 + $0x68] sm:$0xff]  ;;  %v62_v23 = vld [vmem:[#allocation6 + $0x70] sm:$0xff]  ;;  %v63_v24 = vld [vmem:[#allocation6 + $0x78] sm:$0xff] }
  0x2c   :  { %v237_v22 = vpack.c.bf16 %v61_v21, %v60_v20  ;;  %v240_v25 = vpack.c.bf16 %v63_v24, %v62_v23  ;;  %v46_v26 = vld [vmem:[#allocation3] sm:$0xff]  ;;  %p301_p5 = por %p300_p4, %p299_p3 }
  0x2d   :  { %v165_v27 = vld [vmem:[%s398_s2] ss:$0 sm:$0xff] }
  0x2e   :  { %223 = vmatpush3.bf16.msra.mxu0 %v222_v7  ;;  %p302_p6 = pnand %p301_p5, %p295_p2 }
  0x2f   :  { %224 = vmatprep.subr.bf16.mxu0 %v326_v0 }
  0x32   :  { %226 = vmatpush3.bf16.msra.mxu0 %v225_v10 }
  0x33   :  { %227 = vmatprep.subr.bf16.mxu0 %v326_v0 }
  0x36   :  { %229 = vmatpush3.bf16.msra.mxu0 %v228_v13 }
  0x37   :  { %230 = vmatprep.subr.bf16.mxu0 %v326_v0 }
  0x3a   :  { %232 = vmatpush3.bf16.msra.mxu0 %v231_v16 }
  0x3b   :  { %233 = vmatprep.subr.bf16.mxu0 %v326_v0 }
  0x3e   :  { %235 = vmatpush3.bf16.msra.mxu0 %v234_v19 }
  0x3f   :  { %236 = vmatprep.subr.bf16.mxu0 %v326_v0 }
  0x42   :  { %238 = vmatpush3.bf16.msra.mxu0 %v237_v22 }
  0x43   :  { %239 = vmatprep.subr.bf16.mxu0 %v326_v0 }
  0x46   :  { %241 = vmatpush3.bf16.msra.mxu0 %v240_v25 }
  0x49   :  { %216 = vmatmul.mubr.f32.vlgmr.msra.gmra.mrb[0].mxu0 %v46_v26 }
 0x11c   :  { %v130_v28 = vpop.f32.mrb[0].mxu0 }
 0x11d   :  { %v147_v29 = vadd.f32 %v165_v27, %v130_v28  ;;  %v217_v30 = vpop.f32.mrb[1].mxu0 }
 0x11f   :  { %148 = vst [vmem:[#allocation8] sm:$0xff] %v147_v29 }
 0x120   :  { %305 = shalt.err (!%p302_p6)
}
 0x121   :  { %s306_s16 = scalar_lea.hbm %s399_s3, 128 }
 0x122   :  { %p307_p7 = scmp.ne.s32.totalorder %s399_s3, %s306_s16  ;;  %p310_p8 = scmp.lt.u32.totalorder %s306_s16, %s399_s3 }
 0x124   :  { %p312_p9 = pnand %p310_p8, %p307_p7 }
 0x126   :  { %315 = shalt.err (!%p312_p9)
}
 0x127   :  { %158 = dma.vmem_to_hbm [thread:$0]  %s156_s12, 128, %s399_s3, [#allocation5]  }
 0x128   :  { %320 = dma.done.wait [#allocation5], 128  }
 0x129   :  { %321 = vsyncadd [#allocation5], 4294967168 }
 0x12a   :  { %162 = vsyncpa [#allocation4], 1 }
 0x12b   :  { %163 = vsyncpa [#allocation7], 1 }
 0x12c   :  { %164 = vsyncpa [#allocation5], 1 }

</bundles_post_ra>
